<compile_context>
chip_gen: v5e
topology: v5e:2x2
jax: 0.10.0
libtpu: 0.0.40
codegen_flags: <defaults>
</compile_context>

<pallas_src>
import functools

import jax
import jax.numpy as jnp
from jax import lax
from jax.experimental import pallas as pl
from jax.experimental.pallas import tpu as pltpu

SCALE = 2
IN_FEATURES = 1122
K_PAD = 1152            # 1122 padded up to a multiple of 128 (9 * 128)
H1 = 16 * SCALE         # 32
H2 = 4 * SCALE          # 8
H3 = 2 * SCALE          # 4
OUT = 1

MAX_TILE_B = 512        # batch tile upper bound (multiple of 128)


def _round_up(n, m):
    return (n + m - 1) // m * m


def mlp_kernel(x_ref, w1_ref, b1_ref, w2t_ref, b2_ref,
               w3t_ref, b3_ref, w4_ref, b4_ref, o_ref):
    # ---- Layer 1 on the MXU: (TILE_B, K_PAD) bf16 @ (K_PAD, H1) bf16 -> f32 ----
    h1 = jnp.dot(x_ref[...], w1_ref[...], preferred_element_type=jnp.float32)
    h1 = jnp.maximum(h1 + b1_ref[...], 0.0)                       # (TILE_B, H1) f32

    # ---- Tail layers with the batch on the lane axis (lane-dense output) ----
    # h2t = w2^T @ h1^T  via a transposed-rhs matmul (no explicit big transpose).
    h2t = lax.dot_general(w2t_ref[...], h1, (((1,), (1,)), ((), ())),
                          preferred_element_type=jnp.float32)     # (H2, TILE_B)
    h2t = jnp.maximum(h2t + b2_ref[...], 0.0)

    h3t = jnp.dot(w3t_ref[...], h2t,
                  preferred_element_type=jnp.float32)             # (H3, TILE_B)
    h3t = jnp.maximum(h3t + b3_ref[...], 0.0)

    # ---- Layer 4 (4 -> 1) on the VPU/XLU: broadcast-mul + sublane sum ----
    out = jnp.sum(h3t * w4_ref[...], axis=0, keepdims=True) + b4_ref[...]
    o_ref[...] = out.astype(o_ref.dtype)                          # (1, TILE_B) lane-dense


@functools.partial(jax.jit, static_argnames=())
def net_forward(x, params):
    """x: (B, 1122) float32 (nn.Flatten output).  Returns (B, 1) float32."""
    assert x.ndim == 2 and x.shape[1] == IN_FEATURES
    B = x.shape[0]

    # Adaptive batch tile: one full-extent tile for small batches (avoids
    # wasted compute), capped at MAX_TILE_B; keep the lane axis >= 128 wide
    # whenever possible so the output stores are unmasked.
    tile_b = min(MAX_TILE_B, _round_up(max(B, 8), 128))
    Bp = _round_up(B, tile_b)

    # Layout prep (fused by jit): pad batch + features, cast the streamed
    # operands to bf16 (f32 accumulation preserved inside the kernel).
    x_p = jnp.pad(x, ((0, Bp - B), (0, K_PAD - IN_FEATURES))).astype(jnp.bfloat16)
    w1_p = jnp.pad(params["w1"], ((0, K_PAD - IN_FEATURES), (0, 0))).astype(jnp.bfloat16)
    b1 = params["b1"]                          # (1, H1)
    w2t = params["w2"].T                       # (H2, H1)
    b2c = params["b2"].reshape(H2, 1)          # (H2, 1)
    w3t = params["w3"].T                       # (H3, H2)
    b3c = params["b3"].reshape(H3, 1)          # (H3, 1)
    w4c = params["w4"]                         # (H3, 1) already a column
    b4 = params["b4"].reshape(1, 1)            # (1, 1)

    const = lambda shape: pl.BlockSpec(shape, lambda i: (0, 0))
    grid = (Bp // tile_b,)

    out_padded = pl.pallas_call(
        mlp_kernel,
        out_shape=jax.ShapeDtypeStruct((1, Bp), jnp.float32),
        grid_spec=pltpu.PrefetchScalarGridSpec(
            num_scalar_prefetch=0,
            grid=grid,
            in_specs=[
                # NOTE(v5e): if DMA latency is ever exposed, add
                # pipeline_mode=pl.Buffered(3) to this x BlockSpec.
                pl.BlockSpec((tile_b, K_PAD), lambda i: (i, 0)),   # x tile (streamed)
                const((K_PAD, H1)),                                # w1  (resident)
                const((1, H1)),                                    # b1
                const((H2, H1)),                                   # w2^T
                const((H2, 1)),                                    # b2 (column)
                const((H3, H2)),                                   # w3^T
                const((H3, 1)),                                    # b3 (column)
                const((H3, 1)),                                    # w4 (column)
                const((1, 1)),                                     # b4
            ],
            out_specs=pl.BlockSpec((1, tile_b), lambda i: (0, i)),
        ),
        compiler_params=pltpu.CompilerParams(
            dimension_semantics=("parallel",),
            # 2x(x tile) + resident weights + out tile ~= 2.7 MiB; 32 MiB gives
            # headroom and stays within the v7x 64 MiB physical VMEM.
            vmem_limit_bytes=32 * 1024 * 1024,
        ),
    )(x_p, w1_p, b1, w2t, b2c, w3t, b3c, w4c, b4)

    return out_padded[0, :B].reshape(B, OUT)


def init_params(key):
    """Deterministic parameter init (shapes match the PyTorch module)."""
    ks = jax.random.split(key, 8)

    def linear(kw, kb, fan_in, fan_out):
        bound = 1.0 / jnp.sqrt(fan_in)
        w = jax.random.uniform(kw, (fan_in, fan_out), jnp.float32, -bound, bound)
        b = jax.random.uniform(kb, (1, fan_out), jnp.float32, -bound, bound)
        return w, b

    w1, b1 = linear(ks[0], ks[1], IN_FEATURES, H1)
    w2, b2 = linear(ks[2], ks[3], H1, H2)
    w3, b3 = linear(ks[4], ks[5], H2, H3)
    w4, b4 = linear(ks[6], ks[7], H3, OUT)
    return dict(w1=w1, b1=b1, w2=w2, b2=b2, w3=w3, b3=b3, w4=w4, b4=b4)


def net_forward_ref(x, p):
    # Mirrors the kernel's numerics: bf16 inputs / f32 accumulation on layer 1,
    # f32 everywhere else.
    h = jnp.dot(x.astype(jnp.bfloat16), p["w1"].astype(jnp.bfloat16),
                preferred_element_type=jnp.float32)
    h = jnp.maximum(h + p["b1"], 0.0)
    h = jnp.maximum(h @ p["w2"] + p["b2"], 0.0)
    h = jnp.maximum(h @ p["w3"] + p["b3"], 0.0)
    return h @ p["w4"] + p["b4"]


if __name__ == "__main__":
    key = jax.random.PRNGKey(0)
    k_x, k_p = jax.random.split(key)

    B = 8  # small demo batch; wrapper pads to one 128-row grid step
    x = jax.random.normal(k_x, (B, IN_FEATURES), jnp.float32)
    params = init_params(k_p)

    out = jax.block_until_ready(net_forward(x, params))

    ref = net_forward_ref(x, params)
    assert out.shape == (B, OUT)
    assert jnp.allclose(out, ref, atol=2e-3, rtol=2e-3), \
        float(jnp.max(jnp.abs(out - ref)))

    print("KERNEL_OK")
</pallas_src>

<mosaic_0001>
module attributes {stable_mosaic.version = 11 : i64} {
  func.func @mlp_kernel(%arg0: i32, %arg1: memref<128x1152xbf16, #tpu.memory_space<vmem>>, %arg2: memref<1152x32xbf16, #tpu.memory_space<vmem>>, %arg3: memref<1x32xf32, #tpu.memory_space<vmem>>, %arg4: memref<8x32xf32, #tpu.memory_space<vmem>>, %arg5: memref<8x1xf32, #tpu.memory_space<vmem>>, %arg6: memref<4x8xf32, #tpu.memory_space<vmem>>, %arg7: memref<4x1xf32, #tpu.memory_space<vmem>>, %arg8: memref<4x1xf32, #tpu.memory_space<vmem>>, %arg9: memref<1x1xf32, #tpu.memory_space<vmem>>, %arg10: memref<1x128xf32, #tpu.memory_space<vmem>>) attributes {dimension_semantics = [#tpu.dimension_semantics<parallel>], iteration_bounds = array<i64: 1>, scalar_prefetch = 0 : i64, scratch_operands = 0 : i64, tpu.core_type = #tpu.core_type<tc>, window_params = [{transform_indices = @transform_0, window_bounds = array<i64: 128, 1152>}, {pipeline_mode = #tpu.pipeline_mode<synchronous>, transform_indices = @transform_1, window_bounds = array<i64: 1152, 32>}, {pipeline_mode = #tpu.pipeline_mode<synchronous>, transform_indices = @transform_2, window_bounds = array<i64: 1, 32>}, {pipeline_mode = #tpu.pipeline_mode<synchronous>, transform_indices = @transform_3, window_bounds = array<i64: 8, 32>}, {pipeline_mode = #tpu.pipeline_mode<synchronous>, transform_indices = @transform_4, window_bounds = array<i64: 8, 1>}, {pipeline_mode = #tpu.pipeline_mode<synchronous>, transform_indices = @transform_5, window_bounds = array<i64: 4, 8>}, {pipeline_mode = #tpu.pipeline_mode<synchronous>, transform_indices = @transform_6, window_bounds = array<i64: 4, 1>}, {pipeline_mode = #tpu.pipeline_mode<synchronous>, transform_indices = @transform_7, window_bounds = array<i64: 4, 1>}, {pipeline_mode = #tpu.pipeline_mode<synchronous>, transform_indices = @transform_8, window_bounds = array<i64: 1, 1>}, {transform_indices = @transform_9, window_bounds = array<i64: 1, 128>}]} {
    %c0 = arith.constant 0 : index
    %c0_0 = arith.constant 0 : index
    %0 = vector.load %arg1[%c0, %c0_0] : memref<128x1152xbf16, #tpu.memory_space<vmem>>, vector<128x1152xbf16>
    %c0_1 = arith.constant 0 : index
    %c0_2 = arith.constant 0 : index
    %1 = vector.load %arg2[%c0_1, %c0_2] : memref<1152x32xbf16, #tpu.memory_space<vmem>>, vector<1152x32xbf16>
    %cst = arith.constant dense<0.000000e+00> : vector<128x32xf32>
    %2 = tpu.matmul %0, %1, %cst {dimension_numbers = #tpu.dot_dimension_numbers<[1], [0], [0], [1], [0, 0, 1, 1], [], []>} : vector<128x1152xbf16>, vector<1152x32xbf16>, vector<128x32xf32> -> vector<128x32xf32>
    %c0_3 = arith.constant 0 : index
    %c0_4 = arith.constant 0 : index
    %3 = vector.load %arg3[%c0_3, %c0_4] : memref<1x32xf32, #tpu.memory_space<vmem>>, vector<1x32xf32>
    %4 = vector.broadcast %3 : vector<1x32xf32> to vector<128x32xf32>
    %5 = arith.addf %2, %4 : vector<128x32xf32>
    %cst_5 = arith.constant 0.000000e+00 : f32
    %6 = vector.broadcast %cst_5 : f32 to vector<128x32xf32>
    %7 = arith.maximumf %5, %6 : vector<128x32xf32>
    %c0_6 = arith.constant 0 : index
    %c0_7 = arith.constant 0 : index
    %8 = vector.load %arg4[%c0_6, %c0_7] : memref<8x32xf32, #tpu.memory_space<vmem>>, vector<8x32xf32>
    %cst_8 = arith.constant dense<0.000000e+00> : vector<8x128xf32>
    %9 = tpu.matmul %8, %7, %cst_8 {dimension_numbers = #tpu.dot_dimension_numbers<[1], [1], [0], [0], [0, 0, 1, 0], [], []>} : vector<8x32xf32>, vector<128x32xf32>, vector<8x128xf32> -> vector<8x128xf32>
    %c0_9 = arith.constant 0 : index
    %c0_10 = arith.constant 0 : index
    %10 = vector.load %arg5[%c0_9, %c0_10] : memref<8x1xf32, #tpu.memory_space<vmem>>, vector<8x1xf32>
    %11 = vector.broadcast %10 : vector<8x1xf32> to vector<8x128xf32>
    %12 = arith.addf %9, %11 : vector<8x128xf32>
    %cst_11 = arith.constant 0.000000e+00 : f32
    %13 = vector.broadcast %cst_11 : f32 to vector<8x128xf32>
    %14 = arith.maximumf %12, %13 : vector<8x128xf32>
    %c0_12 = arith.constant 0 : index
    %c0_13 = arith.constant 0 : index
    %15 = vector.load %arg6[%c0_12, %c0_13] : memref<4x8xf32, #tpu.memory_space<vmem>>, vector<4x8xf32>
    %cst_14 = arith.constant dense<0.000000e+00> : vector<4x128xf32>
    %16 = tpu.matmul %15, %14, %cst_14 {dimension_numbers = #tpu.dot_dimension_numbers<[1], [0], [0], [1], [0, 0, 1, 1], [], []>} : vector<4x8xf32>, vector<8x128xf32>, vector<4x128xf32> -> vector<4x128xf32>
    %c0_15 = arith.constant 0 : index
    %c0_16 = arith.constant 0 : index
    %17 = vector.load %arg7[%c0_15, %c0_16] : memref<4x1xf32, #tpu.memory_space<vmem>>, vector<4x1xf32>
    %18 = vector.broadcast %17 : vector<4x1xf32> to vector<4x128xf32>
    %19 = arith.addf %16, %18 : vector<4x128xf32>
    %cst_17 = arith.constant 0.000000e+00 : f32
    %20 = vector.broadcast %cst_17 : f32 to vector<4x128xf32>
    %21 = arith.maximumf %19, %20 : vector<4x128xf32>
    %c0_18 = arith.constant 0 : index
    %c0_19 = arith.constant 0 : index
    %22 = vector.load %arg8[%c0_18, %c0_19] : memref<4x1xf32, #tpu.memory_space<vmem>>, vector<4x1xf32>
    %23 = vector.broadcast %22 : vector<4x1xf32> to vector<4x128xf32>
    %24 = arith.mulf %21, %23 : vector<4x128xf32>
    %cst_20 = arith.constant dense<0.000000e+00> : vector<128xf32>
    %25 = vector.multi_reduction <add>, %24, %cst_20 [0] : vector<4x128xf32> to vector<128xf32>
    %26 = vector.shape_cast %25 : vector<128xf32> to vector<1x128xf32>
    %c0_21 = arith.constant 0 : index
    %c0_22 = arith.constant 0 : index
    %27 = vector.load %arg9[%c0_21, %c0_22] : memref<1x1xf32, #tpu.memory_space<vmem>>, vector<1x1xf32>
    %28 = vector.broadcast %27 : vector<1x1xf32> to vector<1x128xf32>
    %29 = arith.addf %26, %28 : vector<1x128xf32>
    %c0_23 = arith.constant 0 : index
    %c0_24 = arith.constant 0 : index
    %30 = vector.load %arg10[%c0_23, %c0_24] : memref<1x128xf32, #tpu.memory_space<vmem>>, vector<1x128xf32>
    tpu.vector_store %arg10[%c0_23, %c0_24], %29 {strides = array<i32>} : memref<1x128xf32, #tpu.memory_space<vmem>>, vector<1x128xf32>,
    return
  }
  func.func @transform_0(%arg0: i32) -> (i32, i32) {
    %c0_i32 = arith.constant 0 : i32
    %c0_i32_0 = arith.constant 0 : i32
    return %arg0, %c0_i32 : i32, i32
  }
  func.func @transform_1(%arg0: i32) -> (i32, i32) {
    %c0_i32 = arith.constant 0 : i32
    %c0_i32_0 = arith.constant 0 : i32
    %c0_i32_1 = arith.constant 0 : i32
    return %c0_i32, %c0_i32_0 : i32, i32
  }
  func.func @transform_2(%arg0: i32) -> (i32, i32) {
    %c0_i32 = arith.constant 0 : i32
    %c0_i32_0 = arith.constant 0 : i32
    %c0_i32_1 = arith.constant 0 : i32
    return %c0_i32, %c0_i32_0 : i32, i32
  }
  func.func @transform_3(%arg0: i32) -> (i32, i32) {
    %c0_i32 = arith.constant 0 : i32
    %c0_i32_0 = arith.constant 0 : i32
    %c0_i32_1 = arith.constant 0 : i32
    return %c0_i32, %c0_i32_0 : i32, i32
  }
  func.func @transform_4(%arg0: i32) -> (i32, i32) {
    %c0_i32 = arith.constant 0 : i32
    %c0_i32_0 = arith.constant 0 : i32
    %c0_i32_1 = arith.constant 0 : i32
    return %c0_i32, %c0_i32_0 : i32, i32
  }
  func.func @transform_5(%arg0: i32) -> (i32, i32) {
    %c0_i32 = arith.constant 0 : i32
    %c0_i32_0 = arith.constant 0 : i32
    %c0_i32_1 = arith.constant 0 : i32
    return %c0_i32, %c0_i32_0 : i32, i32
  }
  func.func @transform_6(%arg0: i32) -> (i32, i32) {
    %c0_i32 = arith.constant 0 : i32
    %c0_i32_0 = arith.constant 0 : i32
    %c0_i32_1 = arith.constant 0 : i32
    return %c0_i32, %c0_i32_0 : i32, i32
  }
  func.func @transform_7(%arg0: i32) -> (i32, i32) {
    %c0_i32 = arith.constant 0 : i32
    %c0_i32_0 = arith.constant 0 : i32
    %c0_i32_1 = arith.constant 0 : i32
    return %c0_i32, %c0_i32_0 : i32, i32
  }
  func.func @transform_8(%arg0: i32) -> (i32, i32) {
    %c0_i32 = arith.constant 0 : i32
    %c0_i32_0 = arith.constant 0 : i32
    %c0_i32_1 = arith.constant 0 : i32
    return %c0_i32, %c0_i32_0 : i32, i32
  }
  func.func @transform_9(%arg0: i32) -> (i32, i32) {
    %c0_i32 = arith.constant 0 : i32
    %c0_i32_0 = arith.constant 0 : i32
    return %c0_i32, %arg0 : i32, i32
  }
}

</mosaic_0001>

<bundles_post_ra>
// kernel: net_forward.1
= control target key start
LH: loop header
LB: loop body
LE: loop exit
PB: predicated region body
PF: predicated region fallthrough
CT: control target
= control target key end

     0   :  { %vm1526_vm0 = vcmask 261120   ;;  %vm1606_vm1 = vcmask 64512   ;;  %vm1638_vm2 = vcmask 1043456   ;;  %s3294_s1 = inlined_call_operand.vmem [shape: bf16[1152,32], index: 1, kind: input, shape index: {}]   ;;  %s3295_s2 = inlined_call_operand.vmem [shape: f32[1,32], index: 2, kind: input, shape index: {}]   ;;  %s3296_s0 = inlined_call_operand.vmem [shape: bf16[128,1152], index: 0, kind: input, shape index: {}]   ;;  %s3297_s4 = inlined_call_operand.vmem [shape: f32[8,1], index: 4, kind: input, shape index: {}]   ;;  %s3298_s6 = inlined_call_operand.vmem [shape: f32[4,1], index: 6, kind: input, shape index: {}]   ;;  %s3299_s3 = inlined_call_operand.vmem [shape: f32[8,32], index: 3, kind: input, shape index: {}]   ;;  %s3300_s7 = inlined_call_operand.vmem [shape: f32[4,1], index: 7, kind: input, shape index: {}]   ;;  %s3301_s8 = inlined_call_operand.<no memory space> [shape: f32[1,1], index: 8, kind: input, shape index: {}]   ;;  %s3302_s5 = inlined_call_operand.vmem [shape: f32[4,8], index: 5, kind: input, shape index: {}]   ;;  %s3303_s9 = inlined_call_operand.vmem [shape: f32[1,128], index: 9, kind: output, shape index: {}]  }
   0x1   :  { %v2332_v0 = vld [vmem:[%s3294_s1 + $0x38] sm:$0xff]  ;;  %v2331_v1 = vld [vmem:[%s3294_s1 + $0x30] sm:$0xff]  ;;  %v2330_v2 = vld [vmem:[%s3294_s1 + $0x28] sm:$0xff] }
   0x2   :  { %2397 = vmatpush.bf16.msra.mxu1 %v2332_v0  ;;  %2398 = vmatpush.bf16.msra.mxu2 %v2332_v0  ;;  %v2329_v3 = vld [vmem:[%s3294_s1 + $0x20] sm:$0xff]  ;;  %v2328_v4 = vld [vmem:[%s3294_s1 + $0x18] sm:$0xff]  ;;  %v2327_v5 = vld [vmem:[%s3294_s1 + $0x10] sm:$0xff] }
   0x3   :  { %2399 = vmatpush.bf16.msra.mxu3 %v2332_v0  ;;  %1062 = vmatpush.bf16.msra.mxu0 %v2332_v0  ;;  %v2326_v6 = vld [vmem:[%s3294_s1 + $0x8] sm:$0xff]  ;;  %v2325_v7 = vld [vmem:[%s3294_s1] sm:$0xff]  ;;  %v1733_v8 = vld [vmem:[%s3296_s0 + $0x90] sm:$0xf] }
   0x4   :  { %v2275_v9 = vld [vmem:[%s3296_s0 + $0xb0] sm:$0xf0]  ;;  %v1805_v10 = vld [vmem:[%s3296_s0 + $0x120] sm:$0xf]  ;;  %v2293_v11 = vld [vmem:[%s3296_s0 + $0x140] sm:$0xf0] }
   0x5   :  { %v2348_v12 = vld [vmem:[%s3294_s1 + $0xb8] sm:$0xff]  ;;  %v1841_v13 = vld [vmem:[%s3296_s0 + $0x168] sm:$0xf]  ;;  %v2302_v14 = vld [vmem:[%s3296_s0 + $0x188] sm:$0xf0]  ;;  %v1734_v18 = vor.u32 %v2275_v9, %v1733_v8  ;;  %v1806_v19 = vor.u32 %v2293_v11, %v1805_v10 }
   0x6   :  { %2400 = vmatpush.bf16.msra.mxu1 %v2331_v1  ;;  %2401 = vmatpush.bf16.msra.mxu2 %v2331_v1  ;;  %v2340_v15 = vld [vmem:[%s3294_s1 + $0x78] sm:$0xff]  ;;  %v1661_v16 = vld [vmem:[%s3296_s0] sm:$0xf]  ;;  %v2257_v17 = vld [vmem:[%s3296_s0 + $0x20] sm:$0xf0]  ;;  %v1842_v20 = vor.u32 %v2302_v14, %v1841_v13 }
   0x7   :  { %2402 = vmatpush.bf16.msra.mxu3 %v2331_v1  ;;  %1063 = vmatpush.bf16.msra.mxu0 %v2331_v1  ;;  %v2364_v21 = vld [vmem:[%s3294_s1 + $0x138] sm:$0xff]  ;;  %v2347_v22 = vld [vmem:[%s3294_s1 + $0xb0] sm:$0xff]  ;;  %v1662_v23 = vor.u32 %v2257_v17, %v1661_v16  ;;  %v2346_v27 = vld [vmem:[%s3294_s1 + $0xa8] sm:$0xff] }
   0x8   :  { %v2339_v24 = vld [vmem:[%s3294_s1 + $0x70] sm:$0xff]  ;;  %v2356_v25 = vld [vmem:[%s3294_s1 + $0xf8] sm:$0xff]  ;;  %v2338_v28 = vld [vmem:[%s3294_s1 + $0x68] sm:$0xff] }
   0x9   :  { %v2363_v26 = vld [vmem:[%s3294_s1 + $0x130] sm:$0xff]  ;;  %v2362_v30 = vld [vmem:[%s3294_s1 + $0x128] sm:$0xff]  ;;  %v2345_v31 = vld [vmem:[%s3294_s1 + $0xa0] sm:$0xff] }
   0xa   :  { %2403 = vmatpush.bf16.msra.mxu1 %v2330_v2  ;;  %2404 = vmatpush.bf16.msra.mxu2 %v2330_v2  ;;  %v2355_v29 = vld [vmem:[%s3294_s1 + $0xf0] sm:$0xff]  ;;  %v2337_v32 = vld [vmem:[%s3294_s1 + $0x60] sm:$0xff]  ;;  %v2354_v33 = vld [vmem:[%s3294_s1 + $0xe8] sm:$0xff] }
   0xb   :  { %2405 = vmatpush.bf16.msra.mxu3 %v2330_v2  ;;  %1064 = vmatpush.bf16.msra.mxu0 %v2330_v2  ;;  %v2344_v34 = vld [vmem:[%s3294_s1 + $0x98] sm:$0xff]  ;;  %v2361_v37 = vld [vmem:[%s3294_s1 + $0x120] sm:$0xff]  ;;  %v1877_v38 = vld [vmem:[%s3296_s0 + $0x1b0] sm:$0xf] }
   0xc   :  { %v1769_v35 = vld [vmem:[%s3296_s0 + $0xd8] sm:$0xf]  ;;  %v2284_v36 = vld [vmem:[%s3296_s0 + $0xf8] sm:$0xf0]  ;;  %v2311_v39 = vld [vmem:[%s3296_s0 + $0x1d0] sm:$0xf0] }
   0xd   :  { %v2336_v40 = vld [vmem:[%s3294_s1 + $0x58] sm:$0xff]  ;;  %v2353_v41 = vld [vmem:[%s3294_s1 + $0xe0] sm:$0xff]  ;;  %v1697_v42 = vld [vmem:[%s3296_s0 + $0x48] sm:$0xf]  ;;  %v1770_v44 = vor.u32 %v2284_v36, %v1769_v35  ;;  %v1878_v45 = vor.u32 %v2311_v39, %v1877_v38 }
   0xe   :  { %2406 = vmatpush.bf16.msra.mxu1 %v2329_v3  ;;  %2407 = vmatpush.bf16.msra.mxu2 %v2329_v3  ;;  %v2266_v43 = vld [vmem:[%s3296_s0 + $0x68] sm:$0xf0]  ;;  %v2360_v46 = vld [vmem:[%s3294_s1 + $0x118] sm:$0xff]  ;;  %v2343_v47 = vld [vmem:[%s3294_s1 + $0x90] sm:$0xff] }
   0xf   :  { %2408 = vmatpush.bf16.msra.mxu3 %v2329_v3  ;;  %1065 = vmatpush.bf16.msra.mxu0 %v2329_v3  ;;  %v1698_v48 = vor.u32 %v2266_v43, %v1697_v42  ;;  %v2335_v49 = vld [vmem:[%s3294_s1 + $0x50] sm:$0xff]  ;;  %v2352_v50 = vld [vmem:[%s3294_s1 + $0xd8] sm:$0xff]  ;;  %v2342_v52 = vld [vmem:[%s3294_s1 + $0x88] sm:$0xff] }
  0x10   :  { %v2359_v51 = vld [vmem:[%s3294_s1 + $0x110] sm:$0xff]  ;;  %v2334_v53 = vld [vmem:[%s3294_s1 + $0x48] sm:$0xff]  ;;  %v2341_v56 = vld [vmem:[%s3294_s1 + $0x80] sm:$0xff] }
  0x11   :  { %v2351_v54 = vld [vmem:[%s3294_s1 + $0xd0] sm:$0xff]  ;;  %v2358_v55 = vld [vmem:[%s3294_s1 + $0x108] sm:$0xff]  ;;  %v2333_v59 = vld [vmem:[%s3294_s1 + $0x40] sm:$0xff] }
  0x12   :  { %2409 = vmatpush.bf16.msra.mxu1 %v2328_v4  ;;  %2410 = vmatpush.bf16.msra.mxu2 %v2328_v4  ;;  %v1669_v57 = vld [vmem:[%s3296_s0 + $0x8] sm:$0xf]  ;;  %v2258_v58 = vld [vmem:[%s3296_s0 + $0x28] sm:$0xf0]  ;;  %v2253_v62 = vld [vmem:[%s3296_s0 + $0x4] sm:$0xf] }
  0x13   :  { %2411 = vmatpush.bf16.msra.mxu3 %v2328_v4  ;;  %1066 = vmatpush.bf16.msra.mxu0 %v2328_v4  ;;  %v2350_v60 = vld [vmem:[%s3294_s1 + $0xc8] sm:$0xff]  ;;  %v1670_v61 = vor.u32 %v2258_v58, %v1669_v57  ;;  %v2357_v0 = vld [vmem:[%s3294_s1 + $0x100] sm:$0xff]  ;;  %v1913_v1 = vld [vmem:[%s3296_s0 + $0x1f8] sm:$0xf] }
  0x14   :  { %v1663_v63 = vld [vmem:[%s3296_s0 + $0x24] sm:$0xf0]  ;;  %v2320_v2 = vld [vmem:[%s3296_s0 + $0x218] sm:$0xf0]  ;;  %v2349_v3 = vld [vmem:[%s3294_s1 + $0xc0] sm:$0xff] }
  0x15   :  { %v1677_v4 = vld [vmem:[%s3296_s0 + $0x10] sm:$0xf]  ;;  %v2267_v10 = vld [vmem:[%s3296_s0 + $0x70] sm:$0xf0]  ;;  %v2254_v14 = vld [vmem:[%s3296_s0 + $0xc] sm:$0xf] }
  0x16   :  { %2412 = vmatpush.bf16.msra.mxu1 %v2327_v5  ;;  %2413 = vmatpush.bf16.msra.mxu2 %v2327_v5  ;;  %v1705_v9 = vld [vmem:[%s3296_s0 + $0x50] sm:$0xf]  ;;  %v1713_v16 = vld [vmem:[%s3296_s0 + $0x58] sm:$0xf]  ;;  %v2268_v17 = vld [vmem:[%s3296_s0 + $0x78] sm:$0xf0] }
  0x17   :  { %2414 = vmatpush.bf16.msra.mxu3 %v2327_v5  ;;  %1067 = vmatpush.bf16.msra.mxu0 %v2327_v5  ;;  %v2259_v5 = vld [vmem:[%s3296_s0 + $0x30] sm:$0xf0]  ;;  %v1706_v11 = vor.u32 %v2267_v10, %v1705_v9  ;;  %v1699_v13 = vld [vmem:[%s3296_s0 + $0x6c] sm:$0xf0]  ;;  %v2280_v36 = vld [vmem:[%s3296_s0 + $0xdc] sm:$0xf] }
  0x18   :  { %v1678_v8 = vor.u32 %v2259_v5, %v1677_v4  ;;  %v2272_v38 = vld [vmem:[%s3296_s0 + $0x9c] sm:$0xf]  ;;  %v1743_v39 = vld [vmem:[%s3296_s0 + $0xbc] sm:$0xf0]  ;;  %v1843_v4 = vld [vmem:[%s3296_s0 + $0x18c] sm:$0xf0] }
  0x19   :  { %v1746_v43 = vor.u32 %v2272_v38, %v1743_v39  ;;  %v2372_v58 = vld [vmem:[%s3294_s1 + $0x178] sm:$0xff]  ;;  %v2290_v5 = vld [vmem:[%s3296_s0 + $0x12c] sm:$0xf]  ;;  %v2369_v10 = vld [vmem:[%s3294_s1 + $0x160] sm:$0xff] }
  0x1a   :  { %2415 = vmatpush.bf16.msra.mxu1 %v2326_v6  ;;  %2416 = vmatpush.bf16.msra.mxu2 %v2326_v6  ;;  %v2393_v38 = vld [vmem:[%s3294_s1 + $0x220] sm:$0xff] }
  0x1b   :  { %2417 = vmatpush.bf16.msra.mxu3 %v2326_v6  ;;  %1068 = vmatpush.bf16.msra.mxu0 %v2326_v6  ;;  %v1666_v6 = vor.u32 %v2253_v62, %v1663_v63  ;;  %v1849_v62 = vld [vmem:[%s3296_s0 + $0x170] sm:$0xf]  ;;  %v2303_v63 = vld [vmem:[%s3296_s0 + $0x190] sm:$0xf0] }
  0x1e   :  { %2418 = vmatpush.bf16.msra.mxu1 %v2325_v7  ;;  %2419 = vmatpush.bf16.msra.mxu2 %v2325_v7 }
  0x1f   :  { %2420 = vmatpush.bf16.msra.mxu3 %v2325_v7  ;;  %1069 = vmatpush.bf16.msra.mxu0 %v2325_v7  ;;  %v1914_v7 = vor.u32 %v2320_v2, %v1913_v1  ;;  %v2377_v1 = vld [vmem:[%s3294_s1 + $0x1a0] sm:$0xff]  ;;  %v1850_v2 = vor.u32 %v2303_v63, %v1849_v62 }
  0x21   :  { %1080 = vmatmul.bf16.vlgmr.msra.gmra.mxu1 %v1734_v18  ;;  %1090 = vmatmul.bf16.vlgmr.msra.gmra.mxu2 %v1806_v19 }
  0x22   :  { %1160 = vmatpush.bf16.msrb.mxu2 %v2348_v12  ;;  %1111 = vmatpush.bf16.msrb.mxu1 %v2340_v15  ;;  %v2262_v12 = vld [vmem:[%s3296_s0 + $0x4c] sm:$0xf]  ;;  %v1671_v15 = vld [vmem:[%s3296_s0 + $0x2c] sm:$0xf0] }
  0x23   :  { %1095 = vmatmul.bf16.vlgmr.msra.gmra.mxu3 %v1842_v20  ;;  %1258 = vmatpush.bf16.msrb.mxu0 %v2364_v21  ;;  %v1702_v18 = vor.u32 %v2262_v12, %v1699_v13  ;;  %v1674_v19 = vor.u32 %v2254_v14, %v1671_v15  ;;  %v1714_v20 = vor.u32 %v2268_v17, %v1713_v16  ;;  %v1741_v21 = vld [vmem:[%s3296_s0 + $0x98] sm:$0xf]  ;;  %v2375_v17 = vld [vmem:[%s3294_s1 + $0x190] sm:$0xff] }
  0x24   :  { %1070 = vmatmul.bf16.vlgmr.msra.gmra.mxu0 %v1662_v23  ;;  %1209 = vmatpush.bf16.msrb.mxu3 %v2356_v25  ;;  %v1735_v25 = vld [vmem:[%s3296_s0 + $0xb4] sm:$0xf0] }
  0x25   :  { %v2376_v12 = vld [vmem:[%s3294_s1 + $0x198] sm:$0xff] }
  0x26   :  { %1161 = vmatpush.bf16.msrb.mxu2 %v2347_v22  ;;  %1112 = vmatpush.bf16.msrb.mxu1 %v2339_v24  ;;  %v2276_v22 = vld [vmem:[%s3296_s0 + $0xb8] sm:$0xf0]  ;;  %v2271_v24 = vld [vmem:[%s3296_s0 + $0x94] sm:$0xf] }
  0x27   :  { %1259 = vmatpush.bf16.msrb.mxu0 %v2363_v26  ;;  %v1742_v23 = vor.u32 %v2276_v22, %v1741_v21  ;;  %v2263_v26 = vld [vmem:[%s3296_s0 + $0x54] sm:$0xf]  ;;  %v2368_v14 = vld [vmem:[%s3294_s1 + $0x158] sm:$0xff]  ;;  %v2374_v21 = vld [vmem:[%s3294_s1 + $0x188] sm:$0xff] }
  0x28   :  { %1210 = vmatpush.bf16.msrb.mxu3 %v2355_v29  ;;  %v2277_v29 = vld [vmem:[%s3296_s0 + $0xc0] sm:$0xf0]  ;;  %v2388_v15 = vld [vmem:[%s3294_s1 + $0x1f8] sm:$0xff] }
  0x29   :  { %v2396_v16 = vld [vmem:[%s3294_s1 + $0x238] sm:$0xff] }
  0x2a   :  { %1162 = vmatpush.bf16.msrb.mxu2 %v2346_v27  ;;  %1113 = vmatpush.bf16.msrb.mxu1 %v2338_v28  ;;  %v1707_v27 = vld [vmem:[%s3296_s0 + $0x74] sm:$0xf0]  ;;  %v1749_v28 = vld [vmem:[%s3296_s0 + $0xa0] sm:$0xf] }
  0x2b   :  { %1260 = vmatpush.bf16.msrb.mxu0 %v2362_v30  ;;  %v1738_v30 = vor.u32 %v2271_v24, %v1735_v25  ;;  %v1885_v22 = vld [vmem:[%s3296_s0 + $0x1b8] sm:$0xf]  ;;  %v2366_v24 = vld [vmem:[%s3294_s1 + $0x148] sm:$0xff] }
  0x2c   :  { %1211 = vmatpush.bf16.msrb.mxu3 %v2354_v33  ;;  %v1777_v33 = vld [vmem:[%s3296_s0 + $0xe0] sm:$0xf]  ;;  %v2386_v25 = vld [vmem:[%s3294_s1 + $0x1e8] sm:$0xff] }
  0x2e   :  { %1163 = vmatpush.bf16.msrb.mxu2 %v2345_v31  ;;  %1114 = vmatpush.bf16.msrb.mxu1 %v2337_v32  ;;  %v1710_v31 = vor.u32 %v2263_v26, %v1707_v27  ;;  %v1750_v32 = vor.u32 %v2277_v29, %v1749_v28  ;;  %v2394_v26 = vld [vmem:[%s3294_s1 + $0x228] sm:$0xff]  ;;  %v2373_v27 = vld [vmem:[%s3294_s1 + $0x180] sm:$0xff]  ;;  %v2307_v29 = vld [vmem:[%s3296_s0 + $0x1b4] sm:$0xf] }
  0x2f   :  { %1261 = vmatpush.bf16.msrb.mxu0 %v2361_v37  ;;  %v1771_v37 = vld [vmem:[%s3296_s0 + $0xfc] sm:$0xf0] }
  0x30   :  { %1212 = vmatpush.bf16.msrb.mxu3 %v2353_v41  ;;  %v2286_v41 = vld [vmem:[%s3296_s0 + $0x108] sm:$0xf0]  ;;  %v1774_v42 = vor.u32 %v2280_v36, %v1771_v37  ;;  %v2365_v36 = vld [vmem:[%s3294_s1 + $0x140] sm:$0xff] }
  0x31   :  { %1085 = vmatmul.bf16.gmra.mxu1 %v1770_v44  ;;  %v2385_v37 = vld [vmem:[%s3294_s1 + $0x1e0] sm:$0xff] }
  0x32   :  { %1164 = vmatpush.bf16.msrb.mxu2 %v2344_v34  ;;  %1115 = vmatpush.bf16.msrb.mxu1 %v2336_v40  ;;  %v2285_v34 = vld [vmem:[%s3296_s0 + $0x100] sm:$0xf0]  ;;  %v1785_v40 = vld [vmem:[%s3296_s0 + $0xe8] sm:$0xf] }
  0x33   :  { %1100 = vmatmul.bf16.gmra.mxu3 %v1878_v45  ;;  %1262 = vmatpush.bf16.msrb.mxu0 %v2360_v46  ;;  %v1778_v35 = vor.u32 %v2285_v34, %v1777_v33  ;;  %v1786_v44 = vor.u32 %v2286_v41, %v1785_v40  ;;  %v1813_v45 = vld [vmem:[%s3296_s0 + $0x128] sm:$0xf]  ;;  %v2294_v46 = vld [vmem:[%s3296_s0 + $0x148] sm:$0xf0]  ;;  %v1893_v33 = vld [vmem:[%s3296_s0 + $0x1c0] sm:$0xf] }
  0x34   :  { %1075 = vmatmul.bf16.gmra.mxu0 %v1698_v48  ;;  %1213 = vmatpush.bf16.msrb.mxu3 %v2352_v50  ;;  %v2289_v48 = vld [vmem:[%s3296_s0 + $0x124] sm:$0xf] }
  0x35   :  { %v2281_v50 = vld [vmem:[%s3296_s0 + $0xe4] sm:$0xf] }
  0x36   :  { %1165 = vmatpush.bf16.msrb.mxu2 %v2343_v47  ;;  %1116 = vmatpush.bf16.msrb.mxu1 %v2335_v49  ;;  %v1814_v47 = vor.u32 %v2294_v46, %v1813_v45  ;;  %v1807_v49 = vld [vmem:[%s3296_s0 + $0x144] sm:$0xf0]  ;;  %v2313_v34 = vld [vmem:[%s3296_s0 + $0x1e0] sm:$0xf0]  ;;  %v2383_v46 = vld [vmem:[%s3294_s1 + $0x1d0] sm:$0xff] }
  0x37   :  { %1263 = vmatpush.bf16.msrb.mxu0 %v2359_v51  ;;  %v1779_v51 = vld [vmem:[%s3296_s0 + $0x104] sm:$0xf0]  ;;  %v1894_v41 = vor.u32 %v2313_v34, %v1893_v33  ;;  %v1721_v34 = vld [vmem:[%s3296_s0 + $0x60] sm:$0xf] }
  0x38   :  { %1214 = vmatpush.bf16.msrb.mxu3 %v2351_v54  ;;  %v1810_v54 = vor.u32 %v2289_v48, %v1807_v49  ;;  %v1921_v49 = vld [vmem:[%s3296_s0 + $0x200] sm:$0xf] }
  0x3a   :  { %1166 = vmatpush.bf16.msrb.mxu2 %v2342_v52  ;;  %1117 = vmatpush.bf16.msrb.mxu1 %v2334_v53  ;;  %v1821_v52 = vld [vmem:[%s3296_s0 + $0x130] sm:$0xf]  ;;  %v2295_v53 = vld [vmem:[%s3296_s0 + $0x150] sm:$0xf0] }
  0x3b   :  { %1264 = vmatpush.bf16.msrb.mxu0 %v2358_v55  ;;  %v1782_v55 = vor.u32 %v2281_v50, %v1779_v51  ;;  %v1822_v57 = vor.u32 %v2295_v53, %v1821_v52  ;;  %v2321_v50 = vld [vmem:[%s3296_s0 + $0x220] sm:$0xf0]  ;;  %v2382_v52 = vld [vmem:[%s3294_s1 + $0x1c8] sm:$0xff] }
  0x3c   :  { %1215 = vmatpush.bf16.msrb.mxu3 %v2350_v60  ;;  %v2371_v60 = vld [vmem:[%s3294_s1 + $0x170] sm:$0xff]  ;;  %v2390_v53 = vld [vmem:[%s3294_s1 + $0x208] sm:$0xff] }
  0x3e   :  { %1167 = vmatpush.bf16.msrb.mxu2 %v2341_v56  ;;  %1118 = vmatpush.bf16.msrb.mxu1 %v2333_v59  ;;  %v2380_v56 = vld [vmem:[%s3294_s1 + $0x1b8] sm:$0xff]  ;;  %v2379_v59 = vld [vmem:[%s3294_s1 + $0x1b0] sm:$0xff] }
  0x3f   :  { %1265 = vmatpush.bf16.msrb.mxu0 %v2357_v0  ;;  %v2370_v0 = vld [vmem:[%s3294_s1 + $0x168] sm:$0xff] }
  0x40   :  { %1216 = vmatpush.bf16.msrb.mxu3 %v2349_v3  ;;  %v2298_v3 = vld [vmem:[%s3296_s0 + $0x16c] sm:$0xf] }
  0x41   :  { %1168 = vmatmul.bf16.vlgmr.msrb.gmra.mxu2 %v1670_v61  ;;  %1119 = vmatmul.bf16.vlgmr.msrb.gmra.mxu1 %v1666_v6  ;;  %v2378_v61 = vld [vmem:[%s3294_s1 + $0x1a8] sm:$0xff]  ;;  %v1815_v6 = vld [vmem:[%s3296_s0 + $0x14c] sm:$0xf0]  ;;  %v1846_v9 = vor.u32 %v2298_v3, %v1843_v4 }
  0x42   :  { %1356 = vmatpush.bf16.msra.mxu2 %v2380_v56  ;;  %1307 = vmatpush.bf16.msra.mxu1 %v2372_v58  ;;  %v1915_v56 = vld [vmem:[%s3296_s0 + $0x21c] sm:$0xf0] }
  0x43   :  { %1105 = vmatmul.bf16.gmra.mxu3 %v1914_v7  ;;  %v1857_v7 = vld [vmem:[%s3296_s0 + $0x178] sm:$0xf]  ;;  %1454 = vmatpush.bf16.msra.mxu0 %v2396_v16  ;;  %v1887_v58 = vld [vmem:[%s3296_s0 + $0x1dc] sm:$0xf0]  ;;  %v2317_v16 = vld [vmem:[%s3296_s0 + $0x204] sm:$0xf] }
  0x44   :  { %1266 = vmatmul.bf16.vlgmr.msrb.gmra.mxu0 %v1678_v8  ;;  %v2304_v8 = vld [vmem:[%s3296_s0 + $0x198] sm:$0xf0]  ;;  %1405 = vmatpush.bf16.msra.mxu3 %v2388_v15  ;;  %v2959_v15 = vld [vmem:[%s3295_s2] ss:$0 sm:$0xff] }
  0x45   :  { %v1858_v13 = vor.u32 %v2304_v8, %v1857_v7 }
  0x46   :  { %1357 = vmatpush.bf16.msra.mxu2 %v2379_v59  ;;  %1308 = vmatpush.bf16.msra.mxu1 %v2371_v60  ;;  %v1929_v59 = vld [vmem:[%s3296_s0 + $0x208] sm:$0xf]  ;;  %v2322_v60 = vld [vmem:[%s3296_s0 + $0x228] sm:$0xf0] }
  0x47   :  { %v1930_v4 = vor.u32 %v2322_v60, %v1929_v59 }
  0x4a   :  { %1358 = vmatpush.bf16.msra.mxu2 %v2378_v61  ;;  %1309 = vmatpush.bf16.msra.mxu1 %v2370_v0  ;;  %v2381_v0 = vld [vmem:[%s3294_s1 + $0x1c0] sm:$0xff] }
  0x4e   :  { %1359 = vmatpush.bf16.msra.mxu2 %v2377_v1  ;;  %1310 = vmatpush.bf16.msra.mxu1 %v2369_v10  ;;  %v2389_v1 = vld [vmem:[%s3294_s1 + $0x200] sm:$0xff]  ;;  %v2260_v10 = vld [vmem:[%s3296_s0 + $0x38] sm:$0xf0] }
  0x51   :  { %1173 = vmatmul.bf16.gmra.mxu2 %v1706_v11  ;;  %1124 = vmatmul.bf16.gmra.mxu1 %v1702_v18  ;;  %v1818_v11 = vor.u32 %v2290_v5, %v1815_v6  ;;  %v2367_v18 = vld [vmem:[%s3294_s1 + $0x150] sm:$0xff] }
  0x52   :  { %1360 = vmatpush.bf16.msra.mxu2 %v2376_v12  ;;  %1311 = vmatpush.bf16.msra.mxu1 %v2368_v14  ;;  %v1679_v14 = vld [vmem:[%s3296_s0 + $0x34] sm:$0xf0] }
  0x53   :  { %1217 = vmatmul.bf16.vlgmr.msrb.gmra.mxu3 %v1674_v19  ;;  %v2387_v19 = vld [vmem:[%s3294_s1 + $0x1f0] sm:$0xff] }
  0x54   :  { %1271 = vmatmul.bf16.gmra.mxu0 %v1714_v20  ;;  %v2395_v20 = vld [vmem:[%s3294_s1 + $0x230] sm:$0xff]  ;;  %1406 = vmatpush.bf16.msra.mxu3 %v2387_v19  ;;  %v2261_v19 = vld [vmem:[%s3296_s0 + $0x40] sm:$0xf0] }
  0x55   :  { %1455 = vmatpush.bf16.msra.mxu0 %v2395_v20 }
  0x56   :  { %1361 = vmatpush.bf16.msra.mxu2 %v2375_v17  ;;  %1312 = vmatpush.bf16.msra.mxu1 %v2367_v18  ;;  %v1923_v17 = vld [vmem:[%s3296_s0 + $0x224] sm:$0xf0]  ;;  %v1693_v18 = vld [vmem:[%s3296_s0 + $0x20] sm:$0xf] }
  0x58   :  { %1407 = vmatpush.bf16.msra.mxu3 %v2386_v25 }
  0x59   :  { %1456 = vmatpush.bf16.msra.mxu0 %v2394_v26  ;;  %v1694_v26 = vor.u32 %v2261_v19, %v1693_v18  ;;  %v1765_v18 = vld [vmem:[%s3296_s0 + $0xb0] sm:$0xf]  ;;  %v2279_v19 = vld [vmem:[%s3296_s0 + $0xd0] sm:$0xf0] }
  0x5a   :  { %1362 = vmatpush.bf16.msra.mxu2 %v2374_v21  ;;  %1313 = vmatpush.bf16.msra.mxu1 %v2366_v24  ;;  %v1926_v24 = vor.u32 %v2317_v16, %v1923_v17  ;;  %v2265_v16 = vld [vmem:[%s3296_s0 + $0x64] sm:$0xf]  ;;  %v1723_v17 = vld [vmem:[%s3296_s0 + $0x84] sm:$0xf0] }
  0x5c   :  { %1408 = vmatpush.bf16.msra.mxu3 %v2385_v37 }
  0x5d   :  { %1457 = vmatpush.bf16.msra.mxu0 %v2393_v38 }
  0x5e   :  { %1363 = vmatpush.bf16.msra.mxu2 %v2373_v27  ;;  %1314 = vmatpush.bf16.msra.mxu1 %v2365_v36 }
  0x61   :  { %1178 = vmatmul.bf16.gmra.mxu2 %v1742_v23  ;;  %1129 = vmatmul.bf16.gmra.mxu1 %v1738_v30  ;;  %v2312_v23 = vld [vmem:[%s3296_s0 + $0x1d8] sm:$0xf0]  ;;  %v1879_v30 = vld [vmem:[%s3296_s0 + $0x1d4] sm:$0xf0] }
  0x62   :  { %v1886_v28 = vor.u32 %v2312_v23, %v1885_v22 }
  0x63   :  { %1222 = vmatmul.bf16.gmra.mxu3 %v1710_v31  ;;  %v2299_v31 = vld [vmem:[%s3296_s0 + $0x174] sm:$0xf] }
  0x64   :  { %1276 = vmatmul.bf16.gmra.mxu0 %v1750_v32  ;;  %v1851_v32 = vld [vmem:[%s3296_s0 + $0x194] sm:$0xf0] }
  0x65   :  { %v1854_v40 = vor.u32 %v2299_v31, %v1851_v32 }
  0x71   :  { %1183 = vmatmul.bf16.gmra.mxu2 %v1778_v35  ;;  %1134 = vmatmul.bf16.gmra.mxu1 %v1774_v42  ;;  %v1882_v35 = vor.u32 %v2307_v29, %v1879_v30 }
  0x73   :  { %1227 = vmatmul.bf16.gmra.mxu3 %v1746_v43  ;;  %v2384_v43 = vld [vmem:[%s3294_s1 + $0x1d8] sm:$0xff] }
  0x74   :  { %1281 = vmatmul.bf16.gmra.mxu0 %v1786_v44  ;;  %v2392_v44 = vld [vmem:[%s3294_s1 + $0x218] sm:$0xff]  ;;  %1409 = vmatpush.bf16.msra.mxu3 %v2384_v43 }
  0x75   :  { %1458 = vmatpush.bf16.msra.mxu0 %v2392_v44  ;;  %v2256_v43 = vld [vmem:[%s3296_s0 + $0x1c] sm:$0xf]  ;;  %v1687_v44 = vld [vmem:[%s3296_s0 + $0x3c] sm:$0xf0] }
  0x78   :  { %1410 = vmatpush.bf16.msra.mxu3 %v2383_v46  ;;  %v1729_v46 = vld [vmem:[%s3296_s0 + $0x68] sm:$0xf] }
  0x7c   :  { %1411 = vmatpush.bf16.msra.mxu3 %v2382_v52 }
  0x80   :  { %1412 = vmatpush.bf16.msra.mxu3 %v2381_v0 }
  0x81   :  { %1188 = vmatmul.bf16.gmra.mxu2 %v1814_v47  ;;  %1139 = vmatmul.bf16.gmra.mxu1 %v1810_v54  ;;  %v2391_v47 = vld [vmem:[%s3294_s1 + $0x210] sm:$0xff]  ;;  %v1922_v54 = vor.u32 %v2321_v50, %v1921_v49 }
  0x82   :  { %1459 = vmatpush.bf16.msra.mxu0 %v2391_v47  ;;  %v2270_v47 = vld [vmem:[%s3296_s0 + $0x88] sm:$0xf0] }
  0x83   :  { %1232 = vmatmul.bf16.gmra.mxu3 %v1782_v55  ;;  %v2316_v55 = vld [vmem:[%s3296_s0 + $0x1fc] sm:$0xf] }
  0x84   :  { %1286 = vmatmul.bf16.gmra.mxu0 %v1822_v57  ;;  %v2308_v57 = vld [vmem:[%s3296_s0 + $0x1bc] sm:$0xf]  ;;  %v1918_v63 = vor.u32 %v2316_v55, %v1915_v56  ;;  %v1730_v55 = vor.u32 %v2270_v47, %v1729_v46  ;;  %v1787_v47 = vld [vmem:[%s3296_s0 + $0x10c] sm:$0xf0] }
  0x85   :  { %v1890_v3 = vor.u32 %v2308_v57, %v1887_v58 }
  0x86   :  { %1460 = vmatpush.bf16.msra.mxu0 %v2390_v53  ;;  %v1690_v53 = vor.u32 %v2256_v43, %v1687_v44 }
  0x8a   :  { %1461 = vmatpush.bf16.msra.mxu0 %v2389_v1 }
  0x91   :  { %1193 = vmatmul.bf16.gmra.mxu2 %v1850_v2  ;;  %1144 = vmatmul.bf16.gmra.mxu1 %v1846_v9  ;;  %v1685_v9 = vld [vmem:[%s3296_s0 + $0x18] sm:$0xf] }
  0x92   :  { %v1686_v12 = vor.u32 %v2260_v10, %v1685_v9 }
  0x93   :  { %1237 = vmatmul.bf16.gmra.mxu3 %v1818_v11 }
  0x94   :  { %1291 = vmatmul.bf16.gmra.mxu0 %v1858_v13  ;;  %v2255_v13 = vld [vmem:[%s3296_s0 + $0x14] sm:$0xf] }
  0x95   :  { %v1682_v22 = vor.u32 %v2255_v13, %v1679_v14  ;;  %v1751_v14 = vld [vmem:[%s3296_s0 + $0xc4] sm:$0xf0] }
  0x9e   :  { %v2878_v39 = vpop.f32.mrf.mxu1 }
  0xa1   :  { %1198 = vmatmul.bf16.gmra.mxu2 %v1886_v28  ;;  %v1071_v42 = vpop.f32.mrf.mxu0  ;;  %1149 = vmatmul.bf16.gmra.mxu1 %v1882_v35  ;;  %v2269_v35 = vld [vmem:[%s3296_s0 + $0x80] sm:$0xf0] }
  0xa2   :  { %v1072_v20 = vadd.f32 %v2959_v15, %v1071_v42  ;;  %v1715_v42 = vld [vmem:[%s3296_s0 + $0x7c] sm:$0xf0] }
  0xa3   :  { %1242 = vmatmul.bf16.gmra.mxu3 %v1854_v40  ;;  %v1722_v40 = vor.u32 %v2269_v35, %v1721_v34 }
  0xa4   :  { %1296 = vmatmul.bf16.gmra.mxu0 %v1894_v41  ;;  %v2928_v62 = vpop.f32.mrf.mxu2  ;;  %v2264_v41 = vld [vmem:[%s3296_s0 + $0x5c] sm:$0xf] }
  0xa6   :  { %v2886_v45 = vpop.f32.mrf.mxu3  ;;  %v2894_v48 = vpop.f32.mrf.mxu1 }
  0xa7   :  { %v1084_v34 = vadd.f32 %v2959_v15, %v2894_v48  ;;  %v2282_v48 = vld [vmem:[%s3296_s0 + $0xec] sm:$0xf] }
  0xa9   :  { %v1073_v51 = vpop.f32.mrf.mxu0 }
  0xaa   :  { %v1074_v30 = vadd.f32 %v2959_v15, %v1073_v51  ;;  %v1718_v51 = vor.u32 %v2264_v41, %v1715_v42 }
  0xac   :  { %v2942_v8 = vpop.f32.mrf.mxu2 }
  0xae   :  { %v2926_v61 = vpop.f32.mrf.mxu3  ;;  %v2936_v2 = vpop.f32.mrf.mxu1 }
  0xb1   :  { %1203 = vmatmul.bf16.gmra.mxu2 %v1922_v54  ;;  %v1076_v5 = vpop.f32.mrf.mxu0  ;;  %1154 = vmatmul.bf16.gmra.mxu1 %v1918_v63 }
  0xb2   :  { %v1077_v49 = vadd.f32 %v2959_v15, %v1076_v5 }
  0xb3   :  { %1247 = vmatmul.bf16.gmra.mxu3 %v1890_v3  ;;  %v1757_v3 = vld [vmem:[%s3296_s0 + $0xa8] sm:$0xf] }
  0xb4   :  { %1301 = vmatmul.bf16.gmra.mxu0 %v1930_v4  ;;  %v2278_v4 = vld [vmem:[%s3296_s0 + $0xc8] sm:$0xf0] }
  0xb5   :  { %v1758_v13 = vor.u32 %v2278_v4, %v1757_v3 }
  0xb6   :  { %v2938_v6 = vpop.f32.mrf.mxu3  ;;  %v2940_v7 = vpop.f32.mrf.mxu1 }
  0xb9   :  { %v1078_v11 = vpop.f32.mrf.mxu0 }
  0xba   :  { %v1079_v59 = vadd.f32 %v2959_v15, %v1078_v11  ;;  %v2273_v11 = vld [vmem:[%s3296_s0 + $0xa4] sm:$0xf] }
  0xbe   :  { %v2974_v21 = vpop.f32.mrf.mxu3  ;;  %v1120_v23 = vpop.f32.mrf.mxu1 }
  0xbf   :  { %v1121_v25 = vadd.f32 %v1120_v23, %v1072_v20  ;;  %v1082_v20 = vadd.f32 %v2959_v15, %v2878_v39  ;;  %v1754_v23 = vor.u32 %v2273_v11, %v1751_v14  ;;  %v1829_v14 = vld [vmem:[%s3296_s0 + $0x138] sm:$0xf] }
  0xc1   :  { %1364 = vmatmul.bf16.vlgmr.msra.gmra.mxu2 %v1686_v12  ;;  %v1267_v27 = vpop.f32.mrf.mxu0  ;;  %1315 = vmatmul.bf16.vlgmr.msra.gmra.mxu1 %v1682_v22 }
  0xc3   :  { %1252 = vmatmul.bf16.gmra.mxu3 %v1926_v24 }
  0xc4   :  { %v1169_v28 = vpop.f32.mrf.mxu2  ;;  %1462 = vmatmul.bf16.vlgmr.msra.gmra.mxu0 %v1694_v26  ;;  %v1726_v26 = vor.u32 %v2265_v16, %v1723_v17 }
  0xc5   :  { %v1170_v29 = vadd.f32 %v1169_v28, %v1121_v25  ;;  %v1766_v28 = vor.u32 %v2279_v19, %v1765_v18 }
  0xc6   :  { %v2977_v31 = vpop.f32.mrf.mxu3  ;;  %v1122_v32 = vpop.f32.mrf.mxu1 }
  0xc7   :  { %v1123_v33 = vadd.f32 %v1122_v32, %v1074_v30 }
  0xc9   :  { %v1269_v36 = vpop.f32.mrf.mxu0 }
  0xcc   :  { %v1171_v37 = vpop.f32.mrf.mxu2 }
  0xcd   :  { %v1172_v38 = vadd.f32 %v1171_v37, %v1123_v33 }
  0xce   :  { %v3004_v50 = vpop.f32.mrf.mxu3  ;;  %v1125_v52 = vpop.f32.mrf.mxu1 }
  0xcf   :  { %v1126_v54 = vadd.f32 %v1125_v52, %v1077_v49  ;;  %v2274_v49 = vld [vmem:[%s3296_s0 + $0xac] sm:$0xf]  ;;  %v1801_v52 = vld [vmem:[%s3296_s0 + $0xf8] sm:$0xf] }
  0xd1   :  { %1369 = vmatmul.bf16.gmra.mxu2 %v1722_v40  ;;  %v1272_v56 = vpop.f32.mrf.mxu0  ;;  %1320 = vmatmul.bf16.gmra.mxu1 %v1718_v51  ;;  %v1793_v40 = vld [vmem:[%s3296_s0 + $0xf0] sm:$0xf] }
  0xd2   :  { %v1759_v51 = vld [vmem:[%s3296_s0 + $0xcc] sm:$0xf0] }
  0xd3   :  { %1413 = vmatmul.bf16.vlgmr.msra.gmra.mxu3 %v1690_v53  ;;  %v2288_v53 = vld [vmem:[%s3296_s0 + $0x118] sm:$0xf0] }
  0xd4   :  { %v1174_v57 = vpop.f32.mrf.mxu2  ;;  %1467 = vmatmul.bf16.gmra.mxu0 %v1730_v55 }
  0xd5   :  { %v1175_v58 = vadd.f32 %v1174_v57, %v1126_v54  ;;  %v1087_v54 = vadd.f32 %v2959_v15, %v2936_v2 }
  0xd6   :  { %v1218_v60 = vpop.f32.mrf.mxu3  ;;  %v1127_v0 = vpop.f32.mrf.mxu1 }
  0xd7   :  { %v1219_v63 = vadd.f32 %v1218_v60, %v1170_v29  ;;  %v1128_v1 = vadd.f32 %v1127_v0, %v1079_v59  ;;  %v1762_v59 = vor.u32 %v2274_v49, %v1759_v51 }
  0xd9   :  { %v1274_v5 = vpop.f32.mrf.mxu0  ;;  %v3013_v9 = vadd.f32 %v1267_v27, %v1219_v63  ;;  %v1802_v63 = vor.u32 %v2288_v53, %v1801_v52  ;;  %v1859_v53 = vld [vmem:[%s3296_s0 + $0x19c] sm:$0xf0] }
  0xdc   :  { %v1176_v10 = vpop.f32.mrf.mxu2 }
  0xdd   :  { %v1177_v12 = vadd.f32 %v1176_v10, %v1128_v1  ;;  %v1089_v10 = vadd.f32 %v2959_v15, %v2940_v7  ;;  %v2291_v7 = vld [vmem:[%s3296_s0 + $0x134] sm:$0xf] }
  0xde   :  { %v1220_v22 = vpop.f32.mrf.mxu3  ;;  %v1130_v25 = vpop.f32.mrf.mxu1 }
  0xdf   :  { %v1221_v24 = vadd.f32 %v1220_v22, %v1172_v38  ;;  %v1131_v27 = vadd.f32 %v1130_v25, %v1082_v20  ;;  %v1823_v22 = vld [vmem:[%s3296_s0 + $0x154] sm:$0xf0]  ;;  %v1837_v25 = vld [vmem:[%s3296_s0 + $0x140] sm:$0xf] }
  0xe1   :  { %1374 = vmatmul.bf16.gmra.mxu2 %v1758_v13  ;;  %v1277_v29 = vpop.f32.mrf.mxu0  ;;  %v3035_v30 = vadd.f32 %v1269_v36, %v1221_v24  ;;  %1325 = vmatmul.bf16.gmra.mxu1 %v1754_v23  ;;  %v2287_v36 = vld [vmem:[%s3296_s0 + $0x110] sm:$0xf0]  ;;  %v1795_v24 = vld [vmem:[%s3296_s0 + $0x114] sm:$0xf0] }
  0xe2   :  { %v1794_v46 = vor.u32 %v2287_v36, %v1793_v40  ;;  %v2283_v23 = vld [vmem:[%s3296_s0 + $0xf4] sm:$0xf] }
  0xe3   :  { %1418 = vmatmul.bf16.gmra.mxu3 %v1726_v26  ;;  %v2297_v26 = vld [vmem:[%s3296_s0 + $0x160] sm:$0xf0] }
  0xe4   :  { %v1179_v32 = vpop.f32.mrf.mxu2  ;;  %1472 = vmatmul.bf16.gmra.mxu0 %v1766_v28  ;;  %v1826_v28 = vor.u32 %v2291_v7, %v1823_v22  ;;  %v1901_v22 = vld [vmem:[%s3296_s0 + $0x1c8] sm:$0xf] }
  0xe5   :  { %v1180_v33 = vadd.f32 %v1179_v32, %v1131_v27 }
  0xe6   :  { %v1223_v39 = vpop.f32.mrf.mxu3  ;;  %v1132_v37 = vpop.f32.mrf.mxu1 }
  0xe7   :  { %v1224_v35 = vadd.f32 %v1223_v39, %v1175_v58  ;;  %v1133_v38 = vadd.f32 %v1132_v37, %v1084_v34  ;;  %v1838_v34 = vor.u32 %v2297_v26, %v1837_v25 }
  0xe9   :  { %v1279_v41 = vpop.f32.mrf.mxu0  ;;  %v3045_v42 = vadd.f32 %v1272_v56, %v1224_v35  ;;  %v1790_v56 = vor.u32 %v2282_v48, %v1787_v47 }
  0xec   :  { %v1181_v43 = vpop.f32.mrf.mxu2 }
  0xed   :  { %v1182_v44 = vadd.f32 %v1181_v43, %v1133_v38  ;;  %v1094_v38 = vadd.f32 %v2959_v15, %v2942_v8  ;;  %v2300_v8 = vld [vmem:[%s3296_s0 + $0x17c] sm:$0xf] }
  0xee   :  { %v1225_v55 = vpop.f32.mrf.mxu3  ;;  %v1135_v58 = vpop.f32.mrf.mxu1 }
  0xef   :  { %v1226_v57 = vadd.f32 %v1225_v55, %v1177_v12  ;;  %v1136_v60 = vadd.f32 %v1135_v58, %v1087_v54  ;;  %v2292_v54 = vld [vmem:[%s3296_s0 + $0x13c] sm:$0xf]  ;;  %v1831_v55 = vld [vmem:[%s3296_s0 + $0x15c] sm:$0xf0]  ;;  %v1097_v58 = vadd.f32 %v2959_v15, %v2886_v45 }
  0xf1   :  { %1379 = vmatmul.bf16.gmra.mxu2 %v1794_v46  ;;  %v1282_v0 = vpop.f32.mrf.mxu0  ;;  %v3067_v1 = vadd.f32 %v1274_v5, %v1226_v57  ;;  %1330 = vmatmul.bf16.gmra.mxu1 %v1790_v56  ;;  %v2296_v5 = vld [vmem:[%s3296_s0 + $0x158] sm:$0xf0]  ;;  %v1873_v56 = vld [vmem:[%s3296_s0 + $0x188] sm:$0xf]  ;;  %v2306_v57 = vld [vmem:[%s3296_s0 + $0x1a8] sm:$0xf0] }
  0xf2   :  { %v1830_v20 = vor.u32 %v2296_v5, %v1829_v14 }
  0xf3   :  { %1423 = vmatmul.bf16.gmra.mxu3 %v1762_v59 }
  0xf4   :  { %v1184_v3 = vpop.f32.mrf.mxu2  ;;  %1477 = vmatmul.bf16.gmra.mxu0 %v1802_v63  ;;  %v1092_v63 = vadd.f32 %v2959_v15, %v2928_v62 }
  0xf5   :  { %v1185_v4 = vadd.f32 %v1184_v3, %v1136_v60  ;;  %v1862_v60 = vor.u32 %v2300_v8, %v1859_v53  ;;  %v1104_v53 = vadd.f32 %v2959_v15, %v2974_v21  ;;  %v2318_v21 = vld [vmem:[%s3296_s0 + $0x20c] sm:$0xf] }
  0xf6   :  { %v1228_v2 = vpop.f32.mrf.mxu3  ;;  %v1137_v11 = vpop.f32.mrf.mxu1 }
  0xf7   :  { %v1229_v13 = vadd.f32 %v1228_v2, %v1180_v33  ;;  %v1138_v12 = vadd.f32 %v1137_v11, %v1089_v10  ;;  %v1798_v33 = vor.u32 %v2283_v23, %v1795_v24  ;;  %v1874_v2 = vor.u32 %v2306_v57, %v1873_v56  ;;  %v1937_v56 = vld [vmem:[%s3296_s0 + $0x210] sm:$0xf] }
  0xf9   :  { %v1284_v16 = vpop.f32.mrf.mxu0  ;;  %v3077_v17 = vadd.f32 %v1277_v29, %v1229_v13 }
  0xfc   :  { %v1186_v18 = vpop.f32.mrf.mxu2 }
  0xfd   :  { %v1187_v19 = vadd.f32 %v1186_v18, %v1138_v12  ;;  %v1099_v18 = vadd.f32 %v2959_v15, %v2926_v61  ;;  %v2309_v61 = vld [vmem:[%s3296_s0 + $0x1c4] sm:$0xf] }
  0xfe   :  { %v1230_v27 = vpop.f32.mrf.mxu3  ;;  %v1140_v32 = vpop.f32.mrf.mxu1 }
  0xff   :  { %v1231_v29 = vadd.f32 %v1230_v27, %v1182_v44  ;;  %v1865_v44 = vld [vmem:[%s3296_s0 + $0x180] sm:$0xf]  ;;  %v1141_v13 = vadd.f32 %v1140_v32, %v1092_v63  ;;  %v1867_v32 = vld [vmem:[%s3296_s0 + $0x1a4] sm:$0xf0] }
 0x101   :  { %1384 = vmatmul.bf16.gmra.mxu2 %v1830_v20  ;;  %v1287_v39 = vpop.f32.mrf.mxu0  ;;  %v3097_v35 = vadd.f32 %v1279_v41, %v1231_v29  ;;  %1335 = vmatmul.bf16.gmra.mxu1 %v1826_v28  ;;  %v2305_v41 = vld [vmem:[%s3296_s0 + $0x1a0] sm:$0xf0]  ;;  %v1895_v28 = vld [vmem:[%s3296_s0 + $0x1e4] sm:$0xf0] }
 0x102   :  { %v1866_v52 = vor.u32 %v2305_v41, %v1865_v44  ;;  %v2301_v29 = vld [vmem:[%s3296_s0 + $0x184] sm:$0xf] }
 0x103   :  { %1428 = vmatmul.bf16.gmra.mxu3 %v1798_v33  ;;  %v1909_v33 = vld [vmem:[%s3296_s0 + $0x1d0] sm:$0xf] }
 0x104   :  { %v1189_v37 = vpop.f32.mrf.mxu2  ;;  %1482 = vmatmul.bf16.gmra.mxu0 %v1838_v34  ;;  %v2315_v34 = vld [vmem:[%s3296_s0 + $0x1f0] sm:$0xf0] }
 0x105   :  { %v1190_v45 = vadd.f32 %v1189_v37, %v1141_v13  ;;  %v1910_v44 = vor.u32 %v2315_v34, %v1909_v33  ;;  %v1107_v13 = vadd.f32 %v2959_v15, %v2977_v31  ;;  %v1939_v34 = vld [vmem:[%s3296_s0 + $0x234] sm:$0xf0] }
 0x106   :  { %v1233_v40 = vpop.f32.mrf.mxu3  ;;  %v1142_v43 = vpop.f32.mrf.mxu1 }
 0x107   :  { %v1234_v36 = vadd.f32 %v1233_v40, %v1185_v4  ;;  %v1143_v46 = vadd.f32 %v1142_v43, %v1094_v38  ;;  %v1834_v4 = vor.u32 %v2292_v54, %v1831_v55  ;;  %v1898_v38 = vor.u32 %v2309_v61, %v1895_v28 }
 0x108   :  { %v1870_v43 = vor.u32 %v2301_v29, %v1867_v32 }
 0x109   :  { %v1289_v48 = vpop.f32.mrf.mxu0  ;;  %v3107_v47 = vadd.f32 %v1282_v0, %v1234_v36 }
 0x10c   :  { %v1191_v49 = vpop.f32.mrf.mxu2 }
 0x10d   :  { %v1192_v51 = vadd.f32 %v1191_v49, %v1143_v46 }
 0x10e   :  { %v1235_v59 = vpop.f32.mrf.mxu3  ;;  %v1145_v3 = vpop.f32.mrf.mxu1 }
 0x10f   :  { %v1236_v0 = vadd.f32 %v1235_v59, %v1187_v19  ;;  %v1146_v10 = vadd.f32 %v1145_v3, %v1097_v58  ;;  %v2310_v3 = vld [vmem:[%s3296_s0 + $0x1cc] sm:$0xf] }
 0x111   :  { %1389 = vmatmul.bf16.gmra.mxu2 %v1866_v52  ;;  %v1292_v11 = vpop.f32.mrf.mxu0  ;;  %v3131_v12 = vadd.f32 %v1284_v16, %v1236_v0  ;;  %1340 = vmatmul.bf16.gmra.mxu1 %v1862_v60  ;;  %v2314_v16 = vld [vmem:[%s3296_s0 + $0x1e8] sm:$0xf0]  ;;  %v1931_v0 = vld [vmem:[%s3296_s0 + $0x22c] sm:$0xf0] }
 0x112   :  { %v1902_v27 = vor.u32 %v2314_v16, %v1901_v22 }
 0x113   :  { %1433 = vmatmul.bf16.gmra.mxu3 %v1834_v4  ;;  %v1903_v4 = vld [vmem:[%s3296_s0 + $0x1ec] sm:$0xf0] }
 0x114   :  { %v1194_v14 = vpop.f32.mrf.mxu2  ;;  %1487 = vmatmul.bf16.gmra.mxu0 %v1874_v2  ;;  %v2324_v2 = vld [vmem:[%s3296_s0 + $0x238] sm:$0xf0] }
 0x115   :  { %v1195_v5 = vadd.f32 %v1194_v14, %v1146_v10  ;;  %v1945_v10 = vld [vmem:[%s3296_s0 + $0x218] sm:$0xf]  ;;  %v1934_v14 = vor.u32 %v2318_v21, %v1931_v0 }
 0x116   :  { %v1238_v62 = vpop.f32.mrf.mxu3  ;;  %v1147_v20 = vpop.f32.mrf.mxu1 }
 0x117   :  { %v1239_v19 = vadd.f32 %v1238_v62, %v1190_v45  ;;  %v1148_v7 = vadd.f32 %v1147_v20, %v1099_v18  ;;  %v1906_v18 = vor.u32 %v2310_v3, %v1903_v4 }
 0x119   :  { %v1294_v23 = vpop.f32.mrf.mxu0  ;;  %v3141_v24 = vadd.f32 %v1287_v39, %v1239_v19  ;;  %v1102_v39 = vadd.f32 %v2959_v15, %v2938_v6  ;;  %v1946_v19 = vor.u32 %v2324_v2, %v1945_v10 }
 0x11c   :  { %v1196_v25 = vpop.f32.mrf.mxu2 }
 0x11d   :  { %v1197_v26 = vadd.f32 %v1196_v25, %v1148_v7  ;;  %v1109_v25 = vadd.f32 %v2959_v15, %v3004_v50 }
 0x11e   :  { %v1240_v37 = vpop.f32.mrf.mxu3  ;;  %v1150_v36 = vpop.f32.mrf.mxu1 }
 0x11f   :  { %v1241_v40 = vadd.f32 %v1240_v37, %v1192_v51  ;;  %v1151_v46 = vadd.f32 %v1150_v36, %v1102_v39 }
 0x121   :  { %1394 = vmatmul.bf16.gmra.mxu2 %v1902_v27  ;;  %v1297_v41 = vpop.f32.mrf.mxu0  ;;  %v3163_v49 = vadd.f32 %v1289_v48, %v1241_v40  ;;  %1345 = vmatmul.bf16.gmra.mxu1 %v1898_v38  ;;  %v2323_v48 = vld [vmem:[%s3296_s0 + $0x230] sm:$0xf0] }
 0x122   :  { %v1938_v63 = vor.u32 %v2323_v48, %v1937_v56 }
 0x123   :  { %1438 = vmatmul.bf16.gmra.mxu3 %v1870_v43 }
 0x124   :  { %v1199_v52 = vpop.f32.mrf.mxu2  ;;  %1492 = vmatmul.bf16.gmra.mxu0 %v1910_v44 }
 0x125   :  { %v1200_v8 = vadd.f32 %v1199_v52, %v1151_v46 }
 0x126   :  { %v1243_v6 = vpop.f32.mrf.mxu3  ;;  %v1152_v55 = vpop.f32.mrf.mxu1 }
 0x127   :  { %v1244_v54 = vadd.f32 %v1243_v6, %v1195_v5  ;;  %v1153_v51 = vadd.f32 %v1152_v55, %v1104_v53 }
 0x129   :  { %v1299_v57 = vpop.f32.mrf.mxu0  ;;  %v3173_v58 = vadd.f32 %v1292_v11, %v1244_v54 }
 0x12c   :  { %v1201_v59 = vpop.f32.mrf.mxu2 }
 0x12d   :  { %v1202_v60 = vadd.f32 %v1201_v59, %v1153_v51 }
 0x12e   :  { %v1245_v11 = vpop.f32.mrf.mxu3  ;;  %v1155_v45 = vpop.f32.mrf.mxu1 }
 0x12f   :  { %v1246_v5 = vadd.f32 %v1245_v11, %v1197_v26  ;;  %v1156_v62 = vadd.f32 %v1155_v45, %v1107_v13 }
 0x131   :  { %1399 = vmatmul.bf16.gmra.mxu2 %v1938_v63  ;;  %v1302_v20 = vpop.f32.mrf.mxu0  ;;  %v3195_v7 = vadd.f32 %v1294_v23, %v1246_v5  ;;  %1350 = vmatmul.bf16.gmra.mxu1 %v1934_v14  ;;  %v2319_v23 = vld [vmem:[%s3296_s0 + $0x214] sm:$0xf] }
 0x132   :  { %v1942_v50 = vor.u32 %v2319_v23, %v1939_v34 }
 0x133   :  { %1443 = vmatmul.bf16.gmra.mxu3 %v1906_v18 }
 0x134   :  { %v1204_v22 = vpop.f32.mrf.mxu2  ;;  %1497 = vmatmul.bf16.gmra.mxu0 %v1946_v19 }
 0x135   :  { %v1205_v16 = vadd.f32 %v1204_v22, %v1156_v62 }
 0x136   :  { %v1248_v31 = vpop.f32.mrf.mxu3  ;;  %v1157_v61 = vpop.f32.mrf.mxu1 }
 0x137   :  { %v1249_v27 = vadd.f32 %v1248_v31, %v1200_v8  ;;  %v1158_v26 = vadd.f32 %v1157_v61, %v1109_v25 }
 0x139   :  { %v1304_v28 = vpop.f32.mrf.mxu0  ;;  %v3199_v29 = vadd.f32 %v1297_v41, %v1249_v27 }
 0x13c   :  { %v1206_v32 = vpop.f32.mrf.mxu2 }
 0x13d   :  { %v1207_v33 = vadd.f32 %v1206_v32, %v1158_v26 }
 0x13e   :  { %v1250_v39 = vpop.f32.mrf.mxu3  ;;  %v1316_v15 = vpop.f32.mrf.mxu1 }
 0x13f   :  { %v1251_v37 = vadd.f32 %v1250_v39, %v1202_v60  ;;  %v1317_v38 = vadd.f32 %v1316_v15, %v3013_v9 }
 0x141   :  { %v1463_v40 = vpop.f32.mrf.mxu0  ;;  %v3208_v36 = vadd.f32 %v1299_v57, %v1251_v37 }
 0x143   :  { %1448 = vmatmul.bf16.gmra.mxu3 %v1942_v50 }
 0x144   :  { %v1365_v43 = vpop.f32.mrf.mxu2 }
 0x145   :  { %v1366_v46 = vadd.f32 %v1365_v43, %v1317_v38 }
 0x146   :  { %v1253_v44 = vpop.f32.mrf.mxu3  ;;  %v1318_v52 = vpop.f32.mrf.mxu1 }
 0x147   :  { %v1254_v41 = vadd.f32 %v1253_v44, %v1205_v16  ;;  %v1319_v8 = vadd.f32 %v1318_v52, %v3035_v30 }
 0x149   :  { %v1465_v53 = vpop.f32.mrf.mxu0  ;;  %v3211_v6 = vadd.f32 %v1302_v20, %v1254_v41 }
 0x14c   :  { %v1367_v54 = vpop.f32.mrf.mxu2 }
 0x14d   :  { %v1368_v55 = vadd.f32 %v1367_v54, %v1319_v8 }
 0x14e   :  { %v1255_v51 = vpop.f32.mrf.mxu3  ;;  %v1321_v48 = vpop.f32.mrf.mxu1 }
 0x14f   :  { %v1256_v56 = vadd.f32 %v1255_v51, %v1207_v33  ;;  %v1322_v9 = vadd.f32 %v1321_v48, %v3045_v42 }
 0x151   :  { %v1468_v57 = vpop.f32.mrf.mxu0  ;;  %v3214_v59 = vadd.f32 %v1304_v28, %v1256_v56 }
 0x154   :  { %v1370_v60 = vpop.f32.mrf.mxu2 }
 0x155   :  { %v1371_v63 = vadd.f32 %v1370_v60, %v1322_v9 }
 0x156   :  { %v1414_v21 = vpop.f32.mrf.mxu3  ;;  %v1323_v3 = vpop.f32.mrf.mxu1 }
 0x157   :  { %v1415_v0 = vadd.f32 %v1414_v21, %v1366_v46  ;;  %v1324_v30 = vadd.f32 %v1323_v3, %v3067_v1 }
 0x159   :  { %v3217_v4 = vadd.f32 %v1463_v40, %v1415_v0  ;;  %v1470_v10 = vpop.f32.mrf.mxu0 }
 0x15c   :  { %v1372_v2 = vpop.f32.mrf.mxu2 }
 0x15d   :  { %v1373_v13 = vadd.f32 %v1372_v2, %v1324_v30 }
 0x15e   :  { %v1416_v11 = vpop.f32.mrf.mxu3  ;;  %v1326_v5 = vpop.f32.mrf.mxu1 }
 0x15f   :  { %v1417_v14 = vadd.f32 %v1416_v11, %v1368_v55  ;;  %v1327_v42 = vadd.f32 %v1326_v5, %v3077_v17 }
 0x161   :  { %v3220_v45 = vadd.f32 %v1465_v53, %v1417_v14  ;;  %v1473_v18 = vpop.f32.mrf.mxu0 }
 0x164   :  { %v1375_v62 = vpop.f32.mrf.mxu2 }
 0x165   :  { %v1376_v19 = vadd.f32 %v1375_v62, %v1327_v42 }
 0x166   :  { %v1419_v20 = vpop.f32.mrf.mxu3  ;;  %v1328_v16 = vpop.f32.mrf.mxu1 }
 0x167   :  { %v1420_v22 = vadd.f32 %v1419_v20, %v1371_v63  ;;  %v1329_v1 = vadd.f32 %v1328_v16, %v3097_v35 }
 0x169   :  { %v3223_v25 = vadd.f32 %v1468_v57, %v1420_v22  ;;  %v1475_v61 = vpop.f32.mrf.mxu0 }
 0x16c   :  { %v1377_v31 = vpop.f32.mrf.mxu2 }
 0x16d   :  { %v1378_v27 = vadd.f32 %v1377_v31, %v1329_v1 }
 0x16e   :  { %v1421_v26 = vpop.f32.mrf.mxu3  ;;  %v1331_v32 = vpop.f32.mrf.mxu1 }
 0x16f   :  { %v1422_v28 = vadd.f32 %v1421_v26, %v1373_v13  ;;  %v1332_v17 = vadd.f32 %v1331_v32, %v3107_v47 }
 0x171   :  { %v3226_v33 = vadd.f32 %v1470_v10, %v1422_v28  ;;  %v1478_v39 = vpop.f32.mrf.mxu0 }
 0x174   :  { %v1380_v23 = vpop.f32.mrf.mxu2 }
 0x175   :  { %v1381_v34 = vadd.f32 %v1380_v23, %v1332_v17 }
 0x176   :  { %v1424_v37 = vpop.f32.mrf.mxu3  ;;  %v1333_v50 = vpop.f32.mrf.mxu1 }
 0x177   :  { %v1425_v15 = vadd.f32 %v1424_v37, %v1376_v19  ;;  %v1334_v35 = vadd.f32 %v1333_v50, %v3131_v12 }
 0x179   :  { %v3229_v38 = vadd.f32 %v1473_v18, %v1425_v15  ;;  %v1480_v52 = vpop.f32.mrf.mxu0 }
 0x17c   :  { %v1382_v40 = vpop.f32.mrf.mxu2 }
 0x17d   :  { %v1383_v43 = vadd.f32 %v1382_v40, %v1334_v35 }
 0x17e   :  { %v1426_v46 = vpop.f32.mrf.mxu3  ;;  %v1336_v41 = vpop.f32.mrf.mxu1 }
 0x17f   :  { %v1427_v44 = vadd.f32 %v1426_v46, %v1378_v27  ;;  %v1337_v47 = vadd.f32 %v1336_v41, %v3141_v24 }
 0x181   :  { %v3232_v8 = vadd.f32 %v1475_v61, %v1427_v44  ;;  %v1483_v9 = vpop.f32.mrf.mxu0 }
 0x184   :  { %v1385_v53 = vpop.f32.mrf.mxu2 }
 0x185   :  { %v1386_v54 = vadd.f32 %v1385_v53, %v1337_v47 }
 0x186   :  { %v1429_v55 = vpop.f32.mrf.mxu3  ;;  %v1338_v56 = vpop.f32.mrf.mxu1 }
 0x187   :  { %v1430_v51 = vadd.f32 %v1429_v55, %v1381_v34  ;;  %v1339_v48 = vadd.f32 %v1338_v56, %v3163_v49 }
 0x189   :  { %v3235_v12 = vadd.f32 %v1478_v39, %v1430_v51  ;;  %v1485_v3 = vpop.f32.mrf.mxu0 }
 0x18c   :  { %v1387_v57 = vpop.f32.mrf.mxu2 }
 0x18d   :  { %v1388_v60 = vadd.f32 %v1387_v57, %v1339_v48 }
 0x18e   :  { %v1431_v63 = vpop.f32.mrf.mxu3  ;;  %v1341_v24 = vpop.f32.mrf.mxu1 }
 0x18f   :  { %v1432_v21 = vadd.f32 %v1431_v63, %v1383_v43  ;;  %v1342_v57 = vadd.f32 %v1341_v24, %v3173_v58 }
 0x191   :  { %v3237_v0 = vadd.f32 %v1480_v52, %v1432_v21  ;;  %v1488_v11 = vpop.f32.mrf.mxu0 }
 0x194   :  { %v1390_v2 = vpop.f32.mrf.mxu2 }
 0x196   :  { %v1434_v30 = vpop.f32.mrf.mxu3  ;;  %v1343_v14 = vpop.f32.mrf.mxu1 }
 0x197   :  { %v1435_v10 = vadd.f32 %v1434_v30, %v1386_v54 }
 0x199   :  { %v3239_v13 = vadd.f32 %v1483_v9, %v1435_v10  ;;  %v1490_v19 = vpop.f32.mrf.mxu0 }
 0x19b   :  { %v1511_v24 = vmax.f32 %v3239_v13, 0.0  ;;  %v1508_v13 = vmax.f32 %v3232_v8, 0.0  ;;  %v1504_v8 = vmax.f32 %v3220_v45, 0.0  ;;  %v14_v45 = vstv %s3301_s8 }
 0x19c   :  { %v1392_v18 = vpop.f32.mrf.mxu2  ;;  %15 = vst [vmem:[#allocation2] sm:$0x1] %v14_v45 }
 0x19e   :  { %v1436_v5 = vpop.f32.mrf.mxu3  ;;  %v1346_v20 = vpop.f32.mrf.mxu1 }
 0x19f   :  { %v1437_v49 = vadd.f32 %v1436_v5, %v1388_v60  ;;  %v1347_v47 = vadd.f32 %v1346_v20, %v3199_v29  ;;  %v1503_v20 = vmax.f32 %v3217_v4, 0.0 }
 0x1a1   :  { %v1486_v42 = vadd.f32 %v1485_v3, %v1437_v49  ;;  %v1493_v1 = vpop.f32.mrf.mxu0  ;;  %v1391_v3 = vadd.f32 %v1390_v2, %v1342_v57  ;;  %v1510_v2 = vmax.f32 %v3237_v0, 0.0  ;;  %v1600_v0 = vld [vmem:[%s3298_s6] sm:$0xf] }
 0x1a3   :  { %v1512_v58 = vmax.f32 %v1486_v42, 0.0  ;;  %v1509_v42 = vmax.f32 %v3235_v12, 0.0  ;;  %v1505_v12 = vmax.f32 %v3223_v25, 0.0  ;;  %v1631_v25 = vld [vmem:[%s3300_s7] sm:$0xf] }
 0x1a4   :  { %v1395_v22 = vpop.f32.mrf.mxu2 }
 0x1a6   :  { %v1439_v62 = vpop.f32.mrf.mxu3  ;;  %v1348_v31 = vpop.f32.mrf.mxu1 }
 0x1a7   :  { %v1349_v35 = vadd.f32 %v1348_v31, %v3208_v36  ;;  %v1440_v30 = vadd.f32 %v1439_v62, %v1391_v3  ;;  %v1507_v62 = vmax.f32 %v3229_v38, 0.0  ;;  %v1519_v38 = vld [vmem:[%s3299_s3] sm:$0xff] }
 0x1a8   :  { %v1599_v31 = vld [vmem:[%s3302_s5] sm:$0xf] }
 0x1a9   :  { %v1495_v26 = vpop.f32.mrf.mxu0 }
 0x1ac   :  { %v1397_v27 = vpop.f32.mrf.mxu2 }
 0x1ad   :  { %v1398_v53 = vadd.f32 %v1397_v27, %v1349_v35 }
 0x1ae   :  { %v1441_v16 = vpop.f32.mrf.mxu3  ;;  %v1351_v28 = vpop.f32.mrf.mxu1 }
 0x1af   :  { %v1352_v37 = vadd.f32 %v1351_v28, %v3211_v6  ;;  %v1344_v6 = vadd.f32 %v1343_v14, %v3195_v7  ;;  %v1489_v14 = vadd.f32 %v1488_v11, %v1440_v30  ;;  %v2425_v11 = vmov 0  }
 0x1b0   :  { %2422 = vset.pattern.permute.xlu0 %v2425_v11  ;;  %2423 = vset.pattern.permute.xlu1 %v2425_v11 }
 0x1b1   :  { %v1498_v23 = vpop.f32.mrf.mxu0  ;;  %v1393_v60 = vadd.f32 %v1392_v18, %v1344_v6  ;;  %v1513_v49 = vmax.f32 %v1489_v14, 0.0  ;;  %v1520_v18 = vld [vmem:[%s3297_s4] sm:$0xff]  ;;  %1634 = vperm.xlu1 %2423, %v1631_v25  }
 0x1b2   :  { %1523 = vperm.xlu0 %2422, %v1520_v18  }
 0x1b3   :  { %v1442_v29 = vadd.f32 %v1441_v16, %v1393_v60 }
 0x1b4   :  { %v1400_v17 = vpop.f32.mrf.mxu2 }
 0x1b5   :  { %v1401_v40 = vadd.f32 %v1400_v17, %v1352_v37  ;;  %v1491_v10 = vadd.f32 %v1490_v19, %v1442_v29  ;;  %v1506_v19 = vmax.f32 %v3226_v33, 0.0  ;;  %v1646_v33 = vld [vmem:[#allocation2] sm:$0x1] }
 0x1b6   :  { %v1444_v61 = vpop.f32.mrf.mxu3  ;;  %v1353_v34 = vpop.f32.mrf.mxu1 }
 0x1b7   :  { %v1354_v15 = vadd.f32 %v1353_v34, %v3214_v59  ;;  %v1396_v59 = vadd.f32 %v1395_v22, %v1347_v47  ;;  %v1514_v5 = vmax.f32 %v1491_v10, 0.0 }
 0x1b9   :  { %v1500_v52 = vpop.f32.mrf.mxu0  ;;  %v1445_v36 = vadd.f32 %v1444_v61, %v1396_v59  ;;  %1649 = vperm.xlu1 %2423, %v1646_v33  }
 0x1ba   :  { %1603 = vperm.xlu0 %2422, %v1600_v0  }
 0x1bb   :  { %v1494_v63 = vadd.f32 %v1493_v1, %v1445_v36 }
 0x1bc   :  { %v1402_v50 = vpop.f32.mrf.mxu2 }
 0x1bd   :  { %v1403_v43 = vadd.f32 %v1402_v50, %v1354_v15  ;;  %v1515_v7 = vmax.f32 %v1494_v63, 0.0 }
 0x1be   :  { %v1446_v32 = vpop.f32.mrf.mxu3 }
 0x1bf   :  { %v1447_v55 = vadd.f32 %v1446_v32, %v1398_v53 }
 0x1c1   :  { %v1496_v48 = vadd.f32 %v1495_v26, %v1447_v55 }
 0x1c3   :  { %v1516_v21 = vmax.f32 %v1496_v48, 0.0 }
 0x1c6   :  { %v1449_v39 = vpop.f32.mrf.mxu3 }
 0x1c7   :  { %v1450_v44 = vadd.f32 %v1449_v39, %v1401_v40 }
 0x1c9   :  { %v1499_v51 = vadd.f32 %v1498_v23, %v1450_v44 }
 0x1cb   :  { %v1517_v9 = vmax.f32 %v1499_v51, 0.0 }
 0x1ce   :  { %v1451_v46 = vpop.f32.mrf.mxu3 }
 0x1cf   :  { %v1452_v41 = vadd.f32 %v1451_v46, %v1403_v43 }
 0x1d1   :  { %v1501_v54 = vadd.f32 %v1500_v52, %v1452_v41 }
 0x1d3   :  { %v1518_v56 = vmax.f32 %v1501_v54, 0.0 }
 0x1d5   :  { %2235 = vmatpush.xpose.msk.msrb.mxu1 %vm1526_vm0, %v1518_v56 }
 0x1d9   :  { %2236 = vmatpush.xpose.msk.msrb.mxu1 %vm1526_vm0, %v1517_v9 }
 0x1dd   :  { %2237 = vmatpush.xpose.msk.msrb.mxu1 %vm1526_vm0, %v1516_v21 }
 0x1e1   :  { %2238 = vmatpush.xpose.msk.msrb.mxu1 %vm1526_vm0, %v1515_v7 }
 0x1e5   :  { %2239 = vmatpush.xpose.msk.msrb.mxu1 %vm1526_vm0, %v1514_v5 }
 0x1e9   :  { %2240 = vmatpush.xpose.msk.msrb.mxu1 %vm1526_vm0, %v1513_v49 }
 0x1ed   :  { %2241 = vmatpush.xpose.msk.msrb.mxu1 %vm1526_vm0, %v1512_v58 }
 0x1f1   :  { %2242 = vmatpush.xpose.msk.msrb.mxu1 %vm1526_vm0, %v1511_v24 }
 0x1f5   :  { %2243 = vmatpush.xpose.msk.msrb.mxu1 %vm1526_vm0, %v1510_v2 }
 0x1f9   :  { %2244 = vmatpush.xpose.msk.msrb.mxu1 %vm1526_vm0, %v1509_v42 }
 0x1fd   :  { %2245 = vmatpush.xpose.msk.msrb.mxu1 %vm1526_vm0, %v1508_v13 }
 0x201   :  { %2246 = vmatpush.xpose.msk.msrb.mxu1 %vm1526_vm0, %v1507_v62 }
 0x205   :  { %2247 = vmatpush.xpose.msk.msrb.mxu1 %vm1526_vm0, %v1506_v19 }
 0x209   :  { %2248 = vmatpush.xpose.msk.msrb.mxu1 %vm1526_vm0, %v1505_v12 }
 0x20d   :  { %2249 = vmatpush.xpose.msk.msrb.mxu1 %vm1526_vm0, %v1504_v8 }
 0x211   :  { %2250 = vmatpush.xpose.msk.msrb.mxu1 %vm1526_vm0, %v1503_v20 }
 0x214   :  { %2251 = vmatmul.msk.f32.vlgmr.msrb.gmra.mxu1 %vm1526_vm0, %v1519_v38 }
 0x223   :  { %v1635_v32 = vpop.permute.xlu1 %1634 }
 0x224   :  { %v1524_v4 = vpop.permute.xlu0 %1523 }
 0x22b   :  { %v1650_v50 = vpop.permute.xlu1 %1649 }
 0x22c   :  { %v1604_v27 = vpop.permute.xlu0 %1603  ;;  %v1652_v43 = vperm.slane %v1650_v50, 0 }
 0x291   :  { %v1595_v22 = vpop.f32.mrf.mxu1 }
 0x292   :  { %v1596_v16 = vadd.f32 %v1595_v22, %v1524_v4 }
 0x294   :  { %v1598_v1 = vmax.f32 %v1596_v16, 0.0 }
 0x296   :  { %1625 = vmatpush.msrb.mxu2 %v1598_v1 }
 0x297   :  { %2252 = vmatmul.msk.f32.vlgmr.msrb.gmra.mxu2 %vm1606_vm1, %v1599_v31 }
 0x31a   :  { %v1627_v61 = vpop.f32.mrf.mxu2 }
 0x31b   :  { %v1628_v26 = vadd.f32 %v1627_v61, %v1604_v27 }
 0x31d   :  { %v1630_v28 = vmax.f32 %v1628_v26, 0.0 }
 0x31f   :  { %v1637_v17 = vmul.f32 %v1635_v32, %v1630_v28 }
 0x321   :  { %v1639_v23 = vsel %vm1638_vm2, %v1637_v17, 0.0 }
 0x322   :  { %v1640_v34 = vrot.slane %v1639_v23, 4 }
 0x324   :  { %v1641_v39 = vadd.f32 %v1640_v34, %v1639_v23 }
 0x326   :  { %v1642_v37 = vrot.slane %v1641_v39, 2 }
 0x328   :  { %v1643_v15 = vadd.f32 %v1642_v37, %v1641_v39 }
 0x32a   :  { %v1644_v35 = vrot.slane %v1643_v15, 1 }
 0x32c   :  { %v1645_v40 = vadd.f32 %v1644_v35, %v1643_v15 }
 0x32e   :  { %v1653_v46 = vadd.f32 %v1652_v43, %v1645_v40 }
 0x330   :  { %1654 = vst [vmem:[%s3303_s9] sm:$0x1] %v1653_v46 }

</bundles_post_ra>
